<compile_context>
chip_gen: v5e
topology: v5e:2x2
jax: 0.10.0
libtpu: 0.0.40
codegen_flags: <defaults>
</compile_context>

<pallas_src>
import math

import jax
import jax.numpy as jnp
from jax.experimental import pallas as pl
from jax.experimental.pallas import tpu as pltpu


def make_encoder_layer_kernel(d_model, n_heads, tq, tk):
    hd = d_model // n_heads
    bf16 = jnp.bfloat16
    NEG_INF = -1e9  # replacement value for masked scores (matches the reference semantics)

    def kernel(x_ref, k_ref, v_ref, mask_ref,
               wq_ref, bq_ref, wo_ref, bo_ref, wf_ref, bf_ref,
               out_ref,
               q_sc, m_sc, l_sc, acc_sc):
        ki = pl.program_id(2)
        nk = pl.num_programs(2)

        # ---- per-(batch, query-tile) init: fused Q projection + online-softmax state ----
        @pl.when(ki == 0)
        def _():
            x_q = x_ref[...].astype(bf16)                                   # (TQ, D)
            # One full-width matmul (fills the MXU); 1/sqrt(hd) already folded into wq/bq.
            q = jnp.dot(x_q, wq_ref[...],
                        preferred_element_type=jnp.float32) + bq_ref[...]   # (TQ, D) f32
            qb = q.astype(bf16)
            for h in range(n_heads):                                        # static head split (lane slices)
                q_sc[h] = qb[:, h * hd:(h + 1) * hd]                        # (TQ, hd)
            m_sc[...] = jnp.full(m_sc.shape, -jnp.inf, m_sc.dtype)
            l_sc[...] = jnp.zeros_like(l_sc)
            acc_sc[...] = jnp.zeros_like(acc_sc)

        # ---- one key tile: head-batched scores + online softmax update ----
        s = jnp.einsum("hqe,hke->hqk", q_sc[...], k_ref[...],
                       preferred_element_type=jnp.float32)                  # (H, TQ, TK) f32
        keep = mask_ref[...] != 0.0                                         # (TQ, TK), in-kernel
        s = jnp.where(keep[None, :, :], s, NEG_INF)

        m_prev = m_sc[...]
        m_new = jnp.maximum(m_prev, jnp.max(s, axis=-1, keepdims=True))     # (H, TQ, 1)
        alpha = jnp.exp(m_prev - m_new)
        p = jnp.exp(s - m_new)                                              # un-normalized probs
        l_sc[...] = alpha * l_sc[...] + jnp.sum(p, axis=-1, keepdims=True)
        acc_sc[...] = alpha * acc_sc[...] + jnp.einsum(
            "hqk,hke->hqe", p.astype(bf16), v_ref[...],
            preferred_element_type=jnp.float32)                             # (H, TQ, hd) f32
        m_sc[...] = m_new

        # ---- finalize: deferred normalization, fused output projection, residuals, FF ----
        @pl.when(ki == nk - 1)
        def _():
            ctx = acc_sc[...] * pl.reciprocal(l_sc[...], approx=True)       # (H, TQ, hd)
            ctx = ctx.astype(bf16)
            # merge heads along lanes -> (TQ, D), then one fused (TQ,D)@(D,D) matmul
            ctx_flat = jnp.concatenate([ctx[h] for h in range(n_heads)], axis=-1)
            attn = jnp.dot(ctx_flat, wo_ref[...],
                           preferred_element_type=jnp.float32) + bo_ref[...]
            x1 = attn + x_ref[...]                                          # residual 1 (f32)
            ff = jnp.dot(x1.astype(bf16), wf_ref[...],
                         preferred_element_type=jnp.float32) + bf_ref[...]
            out_ref[...] = (ff + x1).astype(out_ref.dtype)                  # residual 2

    return kernel


def encoder_layer(x, mask, params, n_heads, tq=None, tk=None):
    """x: (B, S, D) f32, mask: (B, S, S) f32 (1=keep, 0=masked). Returns (B, S, D) f32."""
    B, S, D = x.shape
    H = n_heads
    assert D % H == 0
    hd = D // H
    bf16 = jnp.bfloat16
    (wq, bq, wk, bk, wv, bv, wo, bo, wf, bfb) = params

    def pick(n, cands):
        for c in cands:
            if n % c == 0:
                return c
        return n

    if tq is None:
        tq = pick(S, (128,)) if S >= 128 else S
    if tk is None:
        tk = pick(S, (512, 256, 128)) if S >= 128 else S
    assert S % tq == 0 and S % tk == 0
    nq, nk = S // tq, S // tk

    scale = 1.0 / math.sqrt(hd)

    # Fold the attention scale into the Q projection (deletes the per-tile score multiply);
    # matmul weights go to bf16 (MXU), biases stay f32.
    wq_s = (wq * scale).astype(bf16)
    bq_s = (bq * scale).astype(jnp.float32)
    wo_b = wo.astype(bf16)
    wf_b = wf.astype(bf16)
    bo_f = bo.astype(jnp.float32)
    bf_f = bfb.astype(jnp.float32)

    # K / V projections hoisted out of the kernel (one-time XLA work): head-split bf16
    # (B, H, S, hd), same numerics as the kernel (bf16 matmul, f32 accumulate + bias).
    def kv_heads(w, b):
        y = jnp.einsum("bsd,de->bse", x.astype(bf16), w.astype(bf16),
                       preferred_element_type=jnp.float32) + b
        return y.reshape(B, S, H, hd).transpose(0, 2, 1, 3).astype(bf16)

    k_h = kv_heads(wk, bk)
    v_h = kv_heads(wv, bv)

    kernel = make_encoder_layer_kernel(D, H, tq, tk)

    def const_spec(shape):
        n = len(shape)
        # Constant block index across the whole grid -> stays resident; single-buffered
        # to avoid paying 2x VMEM for weights whose block never changes.
        return pl.BlockSpec(shape, lambda b, q, k, _n=n: (0,) * _n,
                            pipeline_mode=pl.Buffered(1))

    grid_spec = pltpu.PrefetchScalarGridSpec(
        num_scalar_prefetch=0,
        grid=(B, nq, nk),
        in_specs=[
            pl.BlockSpec((None, tq, D), lambda b, q, k: (b, q, 0)),          # x query tile
            pl.BlockSpec((None, H, tk, hd), lambda b, q, k: (b, 0, k, 0)),   # K heads tile
            pl.BlockSpec((None, H, tk, hd), lambda b, q, k: (b, 0, k, 0)),   # V heads tile
            pl.BlockSpec((None, tq, tk), lambda b, q, k: (b, q, k)),         # raw mask tile
            const_spec(wq_s.shape), const_spec(bq_s.shape),
            const_spec(wo_b.shape), const_spec(bo_f.shape),
            const_spec(wf_b.shape), const_spec(bf_f.shape),
        ],
        out_specs=pl.BlockSpec((None, tq, D), lambda b, q, k: (b, q, 0)),
        scratch_shapes=[
            pltpu.VMEM((H, tq, hd), bf16),          # Q heads (computed once per query tile)
            pltpu.VMEM((H, tq, 1), jnp.float32),    # running max
            pltpu.VMEM((H, tq, 1), jnp.float32),    # running denom
            pltpu.VMEM((H, tq, hd), jnp.float32),   # un-normalized context accumulator
        ],
    )

    # VMEM budget derived from the actual buffers (double-buffered pipelined blocks,
    # single-buffered weights, scratch, plus score-temporary headroom), clamped so we stay
    # inside v7x's 64 MiB physical VMEM.
    est = (2 * tq * D * 4 * 2                  # x tile + out tile (double-buffered)
           + 2 * 2 * H * tk * hd * 2           # K, V tiles (double-buffered, bf16)
           + 2 * tq * tk * 4                   # mask tile
           + 3 * D * D * 2 + 3 * D * 4         # single-buffered weights + biases
           + H * tq * hd * (2 + 4)             # q_sc + acc_sc
           + 2 * H * tq * 128 * 4              # m/l scratch (lane-padded)
           + 4 * H * tq * tk * 4)              # score temporaries headroom
    vmem_limit = int(min(64 * 1024 * 1024, max(32 * 1024 * 1024, 1.5 * est)))

    return pl.pallas_call(
        kernel,
        out_shape=jax.ShapeDtypeStruct((B, S, D), jnp.float32),
        grid_spec=grid_spec,
        compiler_params=pltpu.CompilerParams(
            # K/V hoisted out of the kernel -> no cross-query-tile dependency, so both the
            # batch and query-tile axes are parallel; the key-tile axis carries the online
            # softmax accumulator and stays arbitrary.
            dimension_semantics=("parallel", "parallel", "arbitrary"),
            vmem_limit_bytes=vmem_limit),
    )(x, k_h, v_h, mask, wq_s, bq_s, wo_b, bo_f, wf_b, bf_f)


def reference_encoder_layer(x, mask, params, n_heads, matmul_dtype=jnp.float32):
    """Plain-JAX reference mirroring the PyTorch forward.

    matmul_dtype=bf16 mirrors the kernel's MXU numerics (bf16 inputs, f32 accumulation)."""
    (wq, bq, wk, bk, wv, bv, wo, bo, wf, bfb) = params
    B, S, D = x.shape
    hd = D // n_heads
    scale = 1.0 / math.sqrt(hd)
    md = matmul_dtype

    def mm(a, w):
        return jnp.dot(a.astype(md), w.astype(md), preferred_element_type=jnp.float32)

    q = mm(x, wq) + bq[0]
    k = mm(x, wk) + bk[0]
    v = mm(x, wv) + bv[0]

    def split(t):  # (B, S, D) -> (B, H, S, hd)
        return t.reshape(B, S, n_heads, hd).transpose(0, 2, 1, 3).astype(md)

    qh, kh, vh = split(q), split(k), split(v)
    s = jnp.einsum("bhqd,bhkd->bhqk", qh, kh, preferred_element_type=jnp.float32) * scale
    s = jnp.where(mask[:, None, :, :] == 0.0, -1e9, s)
    p = jax.nn.softmax(s, axis=-1)
    o = jnp.einsum("bhqk,bhkd->bhqd", p.astype(md), vh, preferred_element_type=jnp.float32)
    o = o.transpose(0, 2, 1, 3).reshape(B, S, D)
    attn_out = mm(o, wo) + bo[0]
    x1 = attn_out + x
    ff = mm(x1, wf) + bfb[0]
    return ff + x1


def init_params(key, d_model):
    """Deterministic synthetic parameters. Linear weights stored as (in, out)."""
    keys = jax.random.split(key, 10)
    scale = 0.1

    def w(k):
        return scale * jax.random.normal(k, (d_model, d_model), jnp.float32)

    def b(k):
        return scale * jax.random.normal(k, (1, d_model), jnp.float32)

    wq, bq = w(keys[0]), b(keys[1])
    wk, bk = w(keys[2]), b(keys[3])
    wv, bv = w(keys[4]), b(keys[5])
    wo, bo = w(keys[6]), b(keys[7])
    wf, bfb = w(keys[8]), b(keys[9])
    return (wq, bq, wk, bk, wv, bv, wo, bo, wf, bfb)


def _run_case(key, B, S, D, H, tq=None, tk=None):
    kx, km, kp = jax.random.split(key, 3)
    x = jax.random.normal(kx, (B, S, D), jnp.float32)
    # Binary mask (1.0 = attend, 0.0 = masked); diagonal kept so softmax is well-defined.
    mask = (jax.random.uniform(km, (B, S, S)) > 0.2).astype(jnp.float32)
    mask = jnp.maximum(mask, jnp.eye(S, dtype=jnp.float32)[None, :, :])
    params = init_params(kp, D)

    out = jax.block_until_ready(encoder_layer(x, mask, params, H, tq=tq, tk=tk))
    assert out.shape == (B, S, D)
    assert bool(jnp.all(jnp.isfinite(out)))

    # Tight check against a reference mirroring the kernel's bf16-MXU / f32-accumulate numerics.
    ref_bf16 = reference_encoder_layer(x, mask, params, H, matmul_dtype=jnp.bfloat16)
    assert jnp.allclose(out, ref_bf16, atol=2e-2, rtol=2e-2), "mismatch vs bf16-matmul reference"
    # Looser sanity check against the pure-f32 PyTorch-equivalent math.
    ref_f32 = reference_encoder_layer(x, mask, params, H, matmul_dtype=jnp.float32)
    assert jnp.allclose(out, ref_f32, atol=5e-2, rtol=5e-2), "mismatch vs f32 reference"


if __name__ == "__main__":
    key = jax.random.PRNGKey(0)
    k1, k2 = jax.random.split(key, 2)

    # Small single-tile case (nq = nk = 1).
    _run_case(k1, B=2, S=8, D=32, H=4)
    # Multi-tile case exercising the online-softmax key loop and multiple query tiles.
    _run_case(k2, B=1, S=256, D=32, H=4, tq=128, tk=128)

    print("KERNEL_OK")
</pallas_src>

<mosaic_0001>
module attributes {stable_mosaic.version = 11 : i64} {
  func.func @kernel(%arg0: i32, %arg1: i32, %arg2: i32, %arg3: memref<1x8x32xf32, #tpu.memory_space<vmem>>, %arg4: memref<1x4x8x8xbf16, #tpu.memory_space<vmem>>, %arg5: memref<1x4x8x8xbf16, #tpu.memory_space<vmem>>, %arg6: memref<1x8x8xf32, #tpu.memory_space<vmem>>, %arg7: memref<32x32xbf16, #tpu.memory_space<vmem>>, %arg8: memref<1x32xf32, #tpu.memory_space<vmem>>, %arg9: memref<32x32xbf16, #tpu.memory_space<vmem>>, %arg10: memref<1x32xf32, #tpu.memory_space<vmem>>, %arg11: memref<32x32xbf16, #tpu.memory_space<vmem>>, %arg12: memref<1x32xf32, #tpu.memory_space<vmem>>, %arg13: memref<1x8x32xf32, #tpu.memory_space<vmem>>, %arg14: memref<4x8x8xbf16, #tpu.memory_space<vmem>>, %arg15: memref<4x8x1xf32, #tpu.memory_space<vmem>>, %arg16: memref<4x8x1xf32, #tpu.memory_space<vmem>>, %arg17: memref<4x8x8xf32, #tpu.memory_space<vmem>>) attributes {dimension_semantics = [#tpu.dimension_semantics<parallel>, #tpu.dimension_semantics<parallel>, #tpu.dimension_semantics<arbitrary>], iteration_bounds = array<i64: 2, 1, 1>, scalar_prefetch = 0 : i64, scratch_operands = 4 : i64, tpu.core_type = #tpu.core_type<tc>, window_params = [{transform_indices = @transform_0, window_bounds = array<i64: 1, 8, 32>}, {transform_indices = @transform_1, window_bounds = array<i64: 1, 4, 8, 8>}, {transform_indices = @transform_2, window_bounds = array<i64: 1, 4, 8, 8>}, {transform_indices = @transform_3, window_bounds = array<i64: 1, 8, 8>}, {pipeline_mode = #tpu.pipeline_mode<synchronous>, transform_indices = @transform_4, window_bounds = array<i64: 32, 32>}, {pipeline_mode = #tpu.pipeline_mode<synchronous>, transform_indices = @transform_5, window_bounds = array<i64: 1, 32>}, {pipeline_mode = #tpu.pipeline_mode<synchronous>, transform_indices = @transform_6, window_bounds = array<i64: 32, 32>}, {pipeline_mode = #tpu.pipeline_mode<synchronous>, transform_indices = @transform_7, window_bounds = array<i64: 1, 32>}, {pipeline_mode = #tpu.pipeline_mode<synchronous>, transform_indices = @transform_8, window_bounds = array<i64: 32, 32>}, {pipeline_mode = #tpu.pipeline_mode<synchronous>, transform_indices = @transform_9, window_bounds = array<i64: 1, 32>}, {transform_indices = @transform_10, window_bounds = array<i64: 1, 8, 32>}]} {
    %c0_i32 = arith.constant 0 : i32
    %0 = arith.cmpi eq, %arg2, %c0_i32 : i32
    %1 = arith.extui %0 : i1 to i32
    %c0_i32_0 = arith.constant 0 : i32
    %2 = arith.cmpi ne, %1, %c0_i32_0 : i32
    scf.if %2 {
      %c0_39 = arith.constant 0 : index
      %c0_40 = arith.constant 0 : index
      %c0_41 = arith.constant 0 : index
      %44 = vector.load %arg3[%c0_39, %c0_40, %c0_41] : memref<1x8x32xf32, #tpu.memory_space<vmem>>, vector<1x8x32xf32>
      %45 = vector.shape_cast %44 : vector<1x8x32xf32> to vector<8x32xf32>
      %46 = arith.truncf %45 : vector<8x32xf32> to vector<8x32xbf16>
      %c0_42 = arith.constant 0 : index
      %c0_43 = arith.constant 0 : index
      %47 = vector.load %arg7[%c0_42, %c0_43] : memref<32x32xbf16, #tpu.memory_space<vmem>>, vector<32x32xbf16>
      %cst_44 = arith.constant dense<0.000000e+00> : vector<8x32xf32>
      %48 = tpu.matmul %46, %47, %cst_44 {dimension_numbers = #tpu.dot_dimension_numbers<[1], [0], [0], [1], [0, 0, 1, 1], [], []>} : vector<8x32xbf16>, vector<32x32xbf16>, vector<8x32xf32> -> vector<8x32xf32>
      %c0_45 = arith.constant 0 : index
      %c0_46 = arith.constant 0 : index
      %49 = vector.load %arg8[%c0_45, %c0_46] : memref<1x32xf32, #tpu.memory_space<vmem>>, vector<1x32xf32>
      %50 = vector.broadcast %49 : vector<1x32xf32> to vector<8x32xf32>
      %51 = arith.addf %48, %50 : vector<8x32xf32>
      %52 = arith.truncf %51 : vector<8x32xf32> to vector<8x32xbf16>
      %53 = vector.extract_strided_slice %52 {offsets = [0, 0], sizes = [8, 8], strides = [1, 1]} : vector<8x32xbf16> to vector<8x8xbf16>
      %c0_47 = arith.constant 0 : index
      %c0_48 = arith.constant 0 : index
      %c0_49 = arith.constant 0 : index
      %54 = vector.load %arg14[%c0_47, %c0_48, %c0_49] : memref<4x8x8xbf16, #tpu.memory_space<vmem>>, vector<1x8x8xbf16>
      %55 = vector.shape_cast %54 : vector<1x8x8xbf16> to vector<8x8xbf16>
      %56 = vector.shape_cast %53 : vector<8x8xbf16> to vector<1x8x8xbf16>
      tpu.vector_store %arg14[%c0_47, %c0_48, %c0_49], %56 {strides = array<i32>} : memref<4x8x8xbf16, #tpu.memory_space<vmem>>, vector<1x8x8xbf16>,
      %57 = vector.extract_strided_slice %52 {offsets = [0, 8], sizes = [8, 8], strides = [1, 1]} : vector<8x32xbf16> to vector<8x8xbf16>
      %c1 = arith.constant 1 : index
      %c0_50 = arith.constant 0 : index
      %c0_51 = arith.constant 0 : index
      %58 = vector.load %arg14[%c1, %c0_50, %c0_51] : memref<4x8x8xbf16, #tpu.memory_space<vmem>>, vector<1x8x8xbf16>
      %59 = vector.shape_cast %58 : vector<1x8x8xbf16> to vector<8x8xbf16>
      %60 = vector.shape_cast %57 : vector<8x8xbf16> to vector<1x8x8xbf16>
      tpu.vector_store %arg14[%c1, %c0_50, %c0_51], %60 {strides = array<i32>} : memref<4x8x8xbf16, #tpu.memory_space<vmem>>, vector<1x8x8xbf16>,
      %61 = vector.extract_strided_slice %52 {offsets = [0, 16], sizes = [8, 8], strides = [1, 1]} : vector<8x32xbf16> to vector<8x8xbf16>
      %c2 = arith.constant 2 : index
      %c0_52 = arith.constant 0 : index
      %c0_53 = arith.constant 0 : index
      %62 = vector.load %arg14[%c2, %c0_52, %c0_53] : memref<4x8x8xbf16, #tpu.memory_space<vmem>>, vector<1x8x8xbf16>
      %63 = vector.shape_cast %62 : vector<1x8x8xbf16> to vector<8x8xbf16>
      %64 = vector.shape_cast %61 : vector<8x8xbf16> to vector<1x8x8xbf16>
      tpu.vector_store %arg14[%c2, %c0_52, %c0_53], %64 {strides = array<i32>} : memref<4x8x8xbf16, #tpu.memory_space<vmem>>, vector<1x8x8xbf16>,
      %65 = vector.extract_strided_slice %52 {offsets = [0, 24], sizes = [8, 8], strides = [1, 1]} : vector<8x32xbf16> to vector<8x8xbf16>
      %c3 = arith.constant 3 : index
      %c0_54 = arith.constant 0 : index
      %c0_55 = arith.constant 0 : index
      %66 = vector.load %arg14[%c3, %c0_54, %c0_55] : memref<4x8x8xbf16, #tpu.memory_space<vmem>>, vector<1x8x8xbf16>
      %67 = vector.shape_cast %66 : vector<1x8x8xbf16> to vector<8x8xbf16>
      %68 = vector.shape_cast %65 : vector<8x8xbf16> to vector<1x8x8xbf16>
      tpu.vector_store %arg14[%c3, %c0_54, %c0_55], %68 {strides = array<i32>} : memref<4x8x8xbf16, #tpu.memory_space<vmem>>, vector<1x8x8xbf16>,
      %cst_56 = arith.constant 0xFF800000 : f32
      %69 = vector.broadcast %cst_56 : f32 to vector<4x8x1xf32>
      %c0_57 = arith.constant 0 : index
      %c0_58 = arith.constant 0 : index
      %c0_59 = arith.constant 0 : index
      %70 = vector.load %arg15[%c0_57, %c0_58, %c0_59] : memref<4x8x1xf32, #tpu.memory_space<vmem>>, vector<4x8x1xf32>
      tpu.vector_store %arg15[%c0_57, %c0_58, %c0_59], %69 {strides = array<i32>} : memref<4x8x1xf32, #tpu.memory_space<vmem>>, vector<4x8x1xf32>,
      %cst_60 = arith.constant 0.000000e+00 : f32
      %71 = vector.broadcast %cst_60 : f32 to vector<4x8x1xf32>
      %c0_61 = arith.constant 0 : index
      %c0_62 = arith.constant 0 : index
      %c0_63 = arith.constant 0 : index
      %72 = vector.load %arg16[%c0_61, %c0_62, %c0_63] : memref<4x8x1xf32, #tpu.memory_space<vmem>>, vector<4x8x1xf32>
      tpu.vector_store %arg16[%c0_61, %c0_62, %c0_63], %71 {strides = array<i32>} : memref<4x8x1xf32, #tpu.memory_space<vmem>>, vector<4x8x1xf32>,
      %cst_64 = arith.constant 0.000000e+00 : f32
      %73 = vector.broadcast %cst_64 : f32 to vector<4x8x8xf32>
      %c0_65 = arith.constant 0 : index
      %c0_66 = arith.constant 0 : index
      %c0_67 = arith.constant 0 : index
      %74 = vector.load %arg17[%c0_65, %c0_66, %c0_67] : memref<4x8x8xf32, #tpu.memory_space<vmem>>, vector<4x8x8xf32>
      tpu.vector_store %arg17[%c0_65, %c0_66, %c0_67], %73 {strides = array<i32>} : memref<4x8x8xf32, #tpu.memory_space<vmem>>, vector<4x8x8xf32>,
    } else {
    }
    %c0 = arith.constant 0 : index
    %c0_1 = arith.constant 0 : index
    %c0_2 = arith.constant 0 : index
    %3 = vector.load %arg14[%c0, %c0_1, %c0_2] : memref<4x8x8xbf16, #tpu.memory_space<vmem>>, vector<4x8x8xbf16>
    %c0_3 = arith.constant 0 : index
    %c0_4 = arith.constant 0 : index
    %c0_5 = arith.constant 0 : index
    %c0_6 = arith.constant 0 : index
    %4 = vector.load %arg4[%c0_3, %c0_4, %c0_5, %c0_6] : memref<1x4x8x8xbf16, #tpu.memory_space<vmem>>, vector<1x4x8x8xbf16>
    %5 = vector.shape_cast %4 : vector<1x4x8x8xbf16> to vector<4x8x8xbf16>
    "tpu.trace_start"() <{level = 10 : i32, message = "hqe,hke->hqk"}> : () -> ()
    %cst = arith.constant dense<0.000000e+00> : vector<4x8x8xf32>
    %6 = tpu.matmul %3, %5, %cst {dimension_numbers = #tpu.dot_dimension_numbers<[2], [2], [1], [1], [0, 0, 0, 1, 1, 1], [0], [0]>} : vector<4x8x8xbf16>, vector<4x8x8xbf16>, vector<4x8x8xf32> -> vector<4x8x8xf32>
    "tpu.trace_stop"() : () -> ()
    %c0_7 = arith.constant 0 : index
    %c0_8 = arith.constant 0 : index
    %c0_9 = arith.constant 0 : index
    %7 = vector.load %arg6[%c0_7, %c0_8, %c0_9] : memref<1x8x8xf32, #tpu.memory_space<vmem>>, vector<1x8x8xf32>
    %8 = vector.shape_cast %7 : vector<1x8x8xf32> to vector<8x8xf32>
    %cst_10 = arith.constant 0.000000e+00 : f32
    %9 = vector.broadcast %cst_10 : f32 to vector<8x8xf32>
    %10 = arith.cmpf one, %8, %9 : vector<8x8xf32>
    %11 = vector.shape_cast %10 : vector<8x8xi1> to vector<1x8x8xi1>
    %cst_11 = arith.constant -1.000000e+09 : f32
    %12 = vector.shape_cast %11 : vector<1x8x8xi1> to vector<1x8x8xi1>
    %13 = vector.broadcast %12 : vector<1x8x8xi1> to vector<4x8x8xi1>
    %14 = vector.broadcast %cst_11 : f32 to vector<4x8x8xf32>
    %15 = arith.select %13, %6, %14 : vector<4x8x8xi1>, vector<4x8x8xf32>
    %c0_12 = arith.constant 0 : index
    %c0_13 = arith.constant 0 : index
    %c0_14 = arith.constant 0 : index
    %16 = vector.load %arg15[%c0_12, %c0_13, %c0_14] : memref<4x8x1xf32, #tpu.memory_space<vmem>>, vector<4x8x1xf32>
    %cst_15 = arith.constant dense<0xFF800000> : vector<4x8xf32>
    %17 = vector.multi_reduction <maximumf>, %15, %cst_15 [2] : vector<4x8x8xf32> to vector<4x8xf32>
    %18 = vector.shape_cast %17 : vector<4x8xf32> to vector<4x8x1xf32>
    %19 = arith.maximumf %16, %18 : vector<4x8x1xf32>
    %20 = arith.subf %16, %19 : vector<4x8x1xf32>
    %21 = math.exp %20 : vector<4x8x1xf32>
    %22 = vector.broadcast %19 : vector<4x8x1xf32> to vector<4x8x8xf32>
    %23 = arith.subf %15, %22 : vector<4x8x8xf32>
    %24 = math.exp %23 : vector<4x8x8xf32>
    %c0_16 = arith.constant 0 : index
    %c0_17 = arith.constant 0 : index
    %c0_18 = arith.constant 0 : index
    %25 = vector.load %arg16[%c0_16, %c0_17, %c0_18] : memref<4x8x1xf32, #tpu.memory_space<vmem>>, vector<4x8x1xf32>
    %26 = arith.mulf %21, %25 : vector<4x8x1xf32>
    %cst_19 = arith.constant dense<0.000000e+00> : vector<4x8xf32>
    %27 = vector.multi_reduction <add>, %24, %cst_19 [2] : vector<4x8x8xf32> to vector<4x8xf32>
    %28 = vector.shape_cast %27 : vector<4x8xf32> to vector<4x8x1xf32>
    %29 = arith.addf %26, %28 : vector<4x8x1xf32>
    %c0_20 = arith.constant 0 : index
    %c0_21 = arith.constant 0 : index
    %c0_22 = arith.constant 0 : index
    %30 = vector.load %arg16[%c0_20, %c0_21, %c0_22] : memref<4x8x1xf32, #tpu.memory_space<vmem>>, vector<4x8x1xf32>
    tpu.vector_store %arg16[%c0_20, %c0_21, %c0_22], %29 {strides = array<i32>} : memref<4x8x1xf32, #tpu.memory_space<vmem>>, vector<4x8x1xf32>,
    %c0_23 = arith.constant 0 : index
    %c0_24 = arith.constant 0 : index
    %c0_25 = arith.constant 0 : index
    %31 = vector.load %arg17[%c0_23, %c0_24, %c0_25] : memref<4x8x8xf32, #tpu.memory_space<vmem>>, vector<4x8x8xf32>
    %32 = vector.broadcast %21 : vector<4x8x1xf32> to vector<4x8x8xf32>
    %33 = arith.mulf %32, %31 : vector<4x8x8xf32>
    %34 = arith.truncf %24 : vector<4x8x8xf32> to vector<4x8x8xbf16>
    %c0_26 = arith.constant 0 : index
    %c0_27 = arith.constant 0 : index
    %c0_28 = arith.constant 0 : index
    %c0_29 = arith.constant 0 : index
    %35 = vector.load %arg5[%c0_26, %c0_27, %c0_28, %c0_29] : memref<1x4x8x8xbf16, #tpu.memory_space<vmem>>, vector<1x4x8x8xbf16>
    %36 = vector.shape_cast %35 : vector<1x4x8x8xbf16> to vector<4x8x8xbf16>
    "tpu.trace_start"() <{level = 10 : i32, message = "hqk,hke->hqe"}> : () -> ()
    %cst_30 = arith.constant dense<0.000000e+00> : vector<4x8x8xf32>
    %37 = tpu.matmul %34, %36, %cst_30 {dimension_numbers = #tpu.dot_dimension_numbers<[2], [1], [1], [2], [0, 0, 0, 1, 1, 2], [0], [0]>} : vector<4x8x8xbf16>, vector<4x8x8xbf16>, vector<4x8x8xf32> -> vector<4x8x8xf32>
    "tpu.trace_stop"() : () -> ()
    %38 = arith.addf %33, %37 : vector<4x8x8xf32>
    %c0_31 = arith.constant 0 : index
    %c0_32 = arith.constant 0 : index
    %c0_33 = arith.constant 0 : index
    %39 = vector.load %arg17[%c0_31, %c0_32, %c0_33] : memref<4x8x8xf32, #tpu.memory_space<vmem>>, vector<4x8x8xf32>
    tpu.vector_store %arg17[%c0_31, %c0_32, %c0_33], %38 {strides = array<i32>} : memref<4x8x8xf32, #tpu.memory_space<vmem>>, vector<4x8x8xf32>,
    %c0_34 = arith.constant 0 : index
    %c0_35 = arith.constant 0 : index
    %c0_36 = arith.constant 0 : index
    %40 = vector.load %arg15[%c0_34, %c0_35, %c0_36] : memref<4x8x1xf32, #tpu.memory_space<vmem>>, vector<4x8x1xf32>
    tpu.vector_store %arg15[%c0_34, %c0_35, %c0_36], %19 {strides = array<i32>} : memref<4x8x1xf32, #tpu.memory_space<vmem>>, vector<4x8x1xf32>,
    %c0_i32_37 = arith.constant 0 : i32
    %41 = arith.cmpi eq, %arg2, %c0_i32_37 : i32
    %42 = arith.extui %41 : i1 to i32
    %c0_i32_38 = arith.constant 0 : i32
    %43 = arith.cmpi ne, %42, %c0_i32_38 : i32
    scf.if %43 {
      %c0_39 = arith.constant 0 : index
      %c0_40 = arith.constant 0 : index
      %c0_41 = arith.constant 0 : index
      %44 = vector.load %arg17[%c0_39, %c0_40, %c0_41] : memref<4x8x8xf32, #tpu.memory_space<vmem>>, vector<4x8x8xf32>
      %c0_42 = arith.constant 0 : index
      %c0_43 = arith.constant 0 : index
      %c0_44 = arith.constant 0 : index
      %45 = vector.load %arg16[%c0_42, %c0_43, %c0_44] : memref<4x8x1xf32, #tpu.memory_space<vmem>>, vector<4x8x1xf32>
      %46 = tpu.reciprocal %45 {approx = true} : vector<4x8x1xf32> -> vector<4x8x1xf32>
      %47 = vector.broadcast %46 : vector<4x8x1xf32> to vector<4x8x8xf32>
      %48 = arith.mulf %44, %47 : vector<4x8x8xf32>
      %49 = arith.truncf %48 : vector<4x8x8xf32> to vector<4x8x8xbf16>
      %50 = vector.extract_strided_slice %49 {offsets = [0, 0, 0], sizes = [1, 8, 8], strides = [1, 1, 1]} : vector<4x8x8xbf16> to vector<1x8x8xbf16>
      %51 = vector.shape_cast %50 : vector<1x8x8xbf16> to vector<8x8xbf16>
      %52 = vector.extract_strided_slice %49 {offsets = [1, 0, 0], sizes = [1, 8, 8], strides = [1, 1, 1]} : vector<4x8x8xbf16> to vector<1x8x8xbf16>
      %53 = vector.shape_cast %52 : vector<1x8x8xbf16> to vector<8x8xbf16>
      %54 = vector.extract_strided_slice %49 {offsets = [2, 0, 0], sizes = [1, 8, 8], strides = [1, 1, 1]} : vector<4x8x8xbf16> to vector<1x8x8xbf16>
      %55 = vector.shape_cast %54 : vector<1x8x8xbf16> to vector<8x8xbf16>
      %56 = vector.extract_strided_slice %49 {offsets = [3, 0, 0], sizes = [1, 8, 8], strides = [1, 1, 1]} : vector<4x8x8xbf16> to vector<1x8x8xbf16>
      %57 = vector.shape_cast %56 : vector<1x8x8xbf16> to vector<8x8xbf16>
      %58 = tpu.concatenate %51, %53, %55, %57 in 1 : vector<8x8xbf16>, vector<8x8xbf16>, vector<8x8xbf16>, vector<8x8xbf16> -> vector<8x32xbf16>
      %c0_45 = arith.constant 0 : index
      %c0_46 = arith.constant 0 : index
      %59 = vector.load %arg9[%c0_45, %c0_46] : memref<32x32xbf16, #tpu.memory_space<vmem>>, vector<32x32xbf16>
      %cst_47 = arith.constant dense<0.000000e+00> : vector<8x32xf32>
      %60 = tpu.matmul %58, %59, %cst_47 {dimension_numbers = #tpu.dot_dimension_numbers<[1], [0], [0], [1], [0, 0, 1, 1], [], []>} : vector<8x32xbf16>, vector<32x32xbf16>, vector<8x32xf32> -> vector<8x32xf32>
      %c0_48 = arith.constant 0 : index
      %c0_49 = arith.constant 0 : index
      %61 = vector.load %arg10[%c0_48, %c0_49] : memref<1x32xf32, #tpu.memory_space<vmem>>, vector<1x32xf32>
      %62 = vector.broadcast %61 : vector<1x32xf32> to vector<8x32xf32>
      %63 = arith.addf %60, %62 : vector<8x32xf32>
      %c0_50 = arith.constant 0 : index
      %c0_51 = arith.constant 0 : index
      %c0_52 = arith.constant 0 : index
      %64 = vector.load %arg3[%c0_50, %c0_51, %c0_52] : memref<1x8x32xf32, #tpu.memory_space<vmem>>, vector<1x8x32xf32>
      %65 = vector.shape_cast %64 : vector<1x8x32xf32> to vector<8x32xf32>
      %66 = arith.addf %63, %65 : vector<8x32xf32>
      %67 = arith.truncf %66 : vector<8x32xf32> to vector<8x32xbf16>
      %c0_53 = arith.constant 0 : index
      %c0_54 = arith.constant 0 : index
      %68 = vector.load %arg11[%c0_53, %c0_54] : memref<32x32xbf16, #tpu.memory_space<vmem>>, vector<32x32xbf16>
      %cst_55 = arith.constant dense<0.000000e+00> : vector<8x32xf32>
      %69 = tpu.matmul %67, %68, %cst_55 {dimension_numbers = #tpu.dot_dimension_numbers<[1], [0], [0], [1], [0, 0, 1, 1], [], []>} : vector<8x32xbf16>, vector<32x32xbf16>, vector<8x32xf32> -> vector<8x32xf32>
      %c0_56 = arith.constant 0 : index
      %c0_57 = arith.constant 0 : index
      %70 = vector.load %arg12[%c0_56, %c0_57] : memref<1x32xf32, #tpu.memory_space<vmem>>, vector<1x32xf32>
      %71 = vector.broadcast %70 : vector<1x32xf32> to vector<8x32xf32>
      %72 = arith.addf %69, %71 : vector<8x32xf32>
      %73 = arith.addf %72, %66 : vector<8x32xf32>
      %c0_58 = arith.constant 0 : index
      %c0_59 = arith.constant 0 : index
      %c0_60 = arith.constant 0 : index
      %74 = vector.load %arg13[%c0_58, %c0_59, %c0_60] : memref<1x8x32xf32, #tpu.memory_space<vmem>>, vector<1x8x32xf32>
      %75 = vector.shape_cast %74 : vector<1x8x32xf32> to vector<8x32xf32>
      %76 = vector.shape_cast %73 : vector<8x32xf32> to vector<1x8x32xf32>
      tpu.vector_store %arg13[%c0_58, %c0_59, %c0_60], %76 {strides = array<i32>} : memref<1x8x32xf32, #tpu.memory_space<vmem>>, vector<1x8x32xf32>,
    } else {
    }
    return
  }
  func.func @transform_0(%arg0: i32, %arg1: i32, %arg2: i32) -> (i32, i32, i32) {
    %c0_i32 = arith.constant 0 : i32
    %c0_i32_0 = arith.constant 0 : i32
    return %arg0, %arg1, %c0_i32 : i32, i32, i32
  }
  func.func @transform_1(%arg0: i32, %arg1: i32, %arg2: i32) -> (i32, i32, i32, i32) {
    %c0_i32 = arith.constant 0 : i32
    %c0_i32_0 = arith.constant 0 : i32
    %c0_i32_1 = arith.constant 0 : i32
    return %arg0, %c0_i32, %arg2, %c0_i32_0 : i32, i32, i32, i32
  }
  func.func @transform_2(%arg0: i32, %arg1: i32, %arg2: i32) -> (i32, i32, i32, i32) {
    %c0_i32 = arith.constant 0 : i32
    %c0_i32_0 = arith.constant 0 : i32
    %c0_i32_1 = arith.constant 0 : i32
    return %arg0, %c0_i32, %arg2, %c0_i32_0 : i32, i32, i32, i32
  }
  func.func @transform_3(%arg0: i32, %arg1: i32, %arg2: i32) -> (i32, i32, i32) {
    %c0_i32 = arith.constant 0 : i32
    return %arg0, %arg1, %arg2 : i32, i32, i32
  }
  func.func @transform_4(%arg0: i32, %arg1: i32, %arg2: i32) -> (i32, i32) {
    %c0_i32 = arith.constant 0 : i32
    %c0_i32_0 = arith.constant 0 : i32
    %c0_i32_1 = arith.constant 0 : i32
    return %c0_i32, %c0_i32_0 : i32, i32
  }
  func.func @transform_5(%arg0: i32, %arg1: i32, %arg2: i32) -> (i32, i32) {
    %c0_i32 = arith.constant 0 : i32
    %c0_i32_0 = arith.constant 0 : i32
    %c0_i32_1 = arith.constant 0 : i32
    return %c0_i32, %c0_i32_0 : i32, i32
  }
  func.func @transform_6(%arg0: i32, %arg1: i32, %arg2: i32) -> (i32, i32) {
    %c0_i32 = arith.constant 0 : i32
    %c0_i32_0 = arith.constant 0 : i32
    %c0_i32_1 = arith.constant 0 : i32
    return %c0_i32, %c0_i32_0 : i32, i32
  }
  func.func @transform_7(%arg0: i32, %arg1: i32, %arg2: i32) -> (i32, i32) {
    %c0_i32 = arith.constant 0 : i32
    %c0_i32_0 = arith.constant 0 : i32
    %c0_i32_1 = arith.constant 0 : i32
    return %c0_i32, %c0_i32_0 : i32, i32
  }
  func.func @transform_8(%arg0: i32, %arg1: i32, %arg2: i32) -> (i32, i32) {
    %c0_i32 = arith.constant 0 : i32
    %c0_i32_0 = arith.constant 0 : i32
    %c0_i32_1 = arith.constant 0 : i32
    return %c0_i32, %c0_i32_0 : i32, i32
  }
  func.func @transform_9(%arg0: i32, %arg1: i32, %arg2: i32) -> (i32, i32) {
    %c0_i32 = arith.constant 0 : i32
    %c0_i32_0 = arith.constant 0 : i32
    %c0_i32_1 = arith.constant 0 : i32
    return %c0_i32, %c0_i32_0 : i32, i32
  }
  func.func @transform_10(%arg0: i32, %arg1: i32, %arg2: i32) -> (i32, i32, i32) {
    %c0_i32 = arith.constant 0 : i32
    %c0_i32_0 = arith.constant 0 : i32
    return %arg0, %arg1, %c0_i32 : i32, i32, i32
  }
}

</mosaic_0001>

<bundles_post_ra>
// kernel: tpu_custom_call.1
= control target key start
LH: loop header
LB: loop body
LE: loop exit
PB: predicated region body
PF: predicated region fallthrough
CT: control target
= control target key end

     0   :  { %s2265_s0 = inlined_call_operand.hbm [shape: f32[2,8,32], index: 0, kind: input, shape index: {}]   ;;  %s2266_s1 = inlined_call_operand.hbm [shape: bf16[2,4,8,8], index: 1, kind: input, shape index: {}]   ;;  %s2267_s2 = inlined_call_operand.hbm [shape: bf16[2,4,8,8], index: 2, kind: input, shape index: {}]   ;;  %s2268_s3 = inlined_call_operand.hbm [shape: f32[2,8,8], index: 3, kind: input, shape index: {}]   ;;  %s2269_s4 = inlined_call_operand.hbm [shape: bf16[32,32], index: 4, kind: input, shape index: {}]   ;;  %s2270_s5 = inlined_call_operand.vmem [shape: f32[1,32], index: 5, kind: input, shape index: {}]   ;;  %s2271_s6 = inlined_call_operand.hbm [shape: bf16[32,32], index: 6, kind: input, shape index: {}]   ;;  %s2272_s7 = inlined_call_operand.vmem [shape: f32[1,32], index: 7, kind: input, shape index: {}]   ;;  %s2273_s8 = inlined_call_operand.hbm [shape: bf16[32,32], index: 8, kind: input, shape index: {}]   ;;  %s2274_s9 = inlined_call_operand.vmem [shape: f32[1,32], index: 9, kind: input, shape index: {}]   ;;  %s2275_s10 = inlined_call_operand.hbm [shape: f32[2,8,32], index: 10, kind: output, shape index: {}]  }
   0x1   :  { %2288 = sst [smem:[#allocation32_spill]] %s2266_s1 }
   0x2   :  { %2289 = sst [smem:[#allocation33_spill]] %s2267_s2 }
   0x3   :  { %2290 = sst [smem:[#allocation34_spill]] %s2269_s4 }
   0x4   :  { %2291 = sst [smem:[#allocation35_spill]] %s2271_s6 }
   0x5   :  { %2292 = sst [smem:[#allocation36_spill]] %s2272_s7 }
   0x6   :  { %2293 = sst [smem:[#allocation37_spill]] %s2274_s9 }
   0x7   :  { %2294 = sst [smem:[#allocation38_spill]] %s2275_s10 }
   0x8   :  { %15 = vsyncpa [#allocation7], 0 }
   0x9   :  { %17 = vsyncpa [#allocation7 + $0x1], 0 }
   0xa   :  { %18 = vsyncpa [#allocation10], 0 }
   0xb   :  { %20 = vsyncpa [#allocation10 + $0x1], 0 }
   0xc   :  { %21 = vsyncpa [#allocation13], 0 }
   0xd   :  { %23 = vsyncpa [#allocation13 + $0x1], 0 }
   0xe   :  { %24 = vsyncpa [#allocation16], 0 }
   0xf   :  { %25 = vsyncpa [#allocation8], 0 }
  0x10   :  { %27 = vsyncpa [#allocation8 + $0x1], 0  ;;  %s1915_s13 = smov 0   ;;  %s1917_s14 = smov 0  }
  0x11   :  { %s1919_s15 = smov 0   ;;  %s1921_s16 = smov 0  }
  0x12   :  { %s1923_s17 = smov 0   ;;  %s1925_s18 = smov 0  }
  0x13 LB: > { %2295 = sst [smem:[#allocation25_spill]] %s1824_s13  ;;  %s1946_s19 = sadd.s32 4294967295, %s1844_s18   ;;  %s1844_s18 = sphi %s1925_s18, %s33_s18   ;;  %s1840_s17 = sphi %s1923_s17, %s2329_s17   ;;  %s1836_s16 = sphi %s1921_s16, %s2328_s16   ;;  %s1832_s15 = sphi %s1919_s15, %s2324_s15   ;;  %s1828_s14 = sphi %s1917_s14, %s2327_s14   ;;  %s1824_s13 = sphi %s1915_s13, %s2326_s13  }
  0x14   : > { %2296 = sst [smem:[#allocation26_spill]] %s1832_s15  ;;  %s1315_s20 = sadd.s32 4294967294, %s1844_s18  }
  0x15   : > { %2297 = sst [smem:[#allocation27_spill]] %s1836_s16  ;;  %p74_p0 = scmp.ne.s32.totalorder %s1828_s14, %s1824_s13 }
  0x16   : > { %p75_p1 = scmp.eq.s32.totalorder %s1946_s19, 0  ;;  %p312_p2 = scmp.eq.s32.totalorder %s1946_s19, 1 }
  0x17   : > { %p318_p3 = scmp.eq.s32.totalorder %s1315_s20, 1  ;;  %p1316_p5 = scmp.ge.s32.totalorder %s1844_s18, 1 }
  0x18   : > { %p1955_p4 = por %p75_p1, %p74_p0  ;;  %p325_p7 = scmp.lt.s32.totalorder %s1844_s18, 3 }
  0x19   : > { %p1960_p6 = por %p318_p3, %p74_p0  ;;  %s2301_s4 = sld [smem:[#allocation34_spill]] }
  0x1a   : > { %p1968_p8 = pnand %p1316_p5, %p325_p7  ;;  %s1846_s27 = smov [#allocation14]  }
  0x1b   : > { %s2299_s22 = scalar_select %p1960_p6, 1, 0 }
  0x1c   : > { %p1409_p9 = pneg %p1968_p8  ;;  %s338_s28 = sshll.u32 %s1846_s27, 4  ;;  %s339_s28 = int_to_ptr.vmem [resolvable:$true] %s338_s28 }
  0x1d   : > { %2300 = sst [smem:[#allocation28_spill]] %s2299_s22  ;;  %s2276_s20 = smov 64  }
  0x1e   : > { %p1976_p10 = pnand %p1409_p9, %p75_p1  ;;  %s2304_s6 = sld [smem:[#allocation35_spill]] }
  0x1f   : > { %s336_s25 = sshll.u32 %s2301_s4, 4  ;;  %s2278_s23 = smov 4   ;;  %s337_s25 = int_to_ptr.hbm [resolvable:$true] %s336_s25 }
  0x20   : > { %1412 = dma.hbm_to_vmem [thread:$0]  (!%p1976_p10), %s337_s25, 256, %s339_s28, [#allocation13], %s2276_s20, %s2276_s20, %s2278_s23  }
  0x21   : > { %s1849_s24 = smov [#allocation15]   ;;  %s52_s30 = sadd.s32 1, %s1840_s17 }
  0x22   : > { %s355_s27 = sshll.u32 %s1849_s24, 4  ;;  %s61_s11 = sadd.s32 1, %s1832_s15  ;;  %s356_s27 = int_to_ptr.vmem [resolvable:$true] %s355_s27 }
  0x23   : > { %p54_p12 = scmp.ge.s32.totalorder %s52_s30, 2  ;;  %p68_p13 = scmp.ne.s32.totalorder %s1832_s15, %s1828_s14 }
  0x24   : > { %s353_s12 = sshll.u32 %s2304_s6, 4  ;;  %p69_p0 = scmp.eq.s32.totalorder %s1844_s18, 0  ;;  %s354_s12 = int_to_ptr.hbm [resolvable:$true] %s353_s12 }
  0x25   : > { %1415 = dma.hbm_to_vmem [thread:$0]  (!%p1976_p10), %s354_s12, 256, %s356_s27, [#allocation16], %s2276_s20, %s2276_s20, %s2278_s23  }
  0x26   : > { %p1439_p3 = scmp.lt.s32.totalorder %s1844_s18, 2  ;;  %s2331_s30 = smov (%p54_p12, %s52_s30), 0 }
  0x27   : > { %2305 = sst [smem:[#allocation29_spill]] %s2331_s30  ;;  %p70_p5 = por %p69_p0, %p68_p13 }
  0x28   : > { %p2004_p7 = por %p312_p2, %p68_p13  ;;  %s56_s28 = ssub.s32 %s1840_s17, %s2331_s30 }
  0x29   : > { %s2011_s12 = sand.u32 1, %s1832_s15   ;;  %p59_p9 = scmp.eq.s32.totalorder %s56_s28, 0 }
  0x2a   : > { %s2306_s25 = scalar_select %p2004_p7, 1, 0 }
  0x2b   : > { %p2013_p11 = pnand %p1439_p3, %p70_p5  ;;  %s2287_s27 = sand.u32 1, %s1844_s18  }
  0x2c   : > { %2307 = sst [smem:[#allocation30_spill]] %s2306_s25  ;;  %s1323_s20 = sshll.u32 %s2011_s12, 4 }
  0x2d   : > { %s2020_s23 = scalar_select %p59_p9, %s1832_s15, %s61_s11  }
  0x2e   : > { %s1379_s4 = sshll.u32 %s1840_s17, 4  ;;  %s2310_s1 = sld [smem:[#allocation32_spill]] }
  0x2f   : > { %2309 = sst [smem:[#allocation31_spill]] %s2020_s23  ;;  %s413_s25 = scalar_lea.vmem [#allocation9], %s1323_s20 }
  0x30   : > { %s422_s30 = sshll.u32 %s413_s25, 4  ;;  %s2028_s28 = scalar_lea.sflag [#allocation10], %s2287_s27  ;;  %s423_s30 = int_to_ptr.vmem [resolvable:$true] %s422_s30 }
  0x31   : > { %s2311_s9 = smov 4   ;;  %s2312_s11 = smov 64  }
  0x32   : > { %s2313_s2 = sld [smem:[#allocation33_spill]]  ;;  %s436_s25 = scalar_lea.vmem [#allocation11], %s1323_s20 }
  0x33   : > { %s370_s27 = sshll.u32 %s2273_s8, 4  ;;  %s1850_s16 = smov [#allocation17]   ;;  %s371_s27 = int_to_ptr.hbm [resolvable:$true] %s370_s27 }
  0x34   : > { %s419_s13 = scalar_lea.hbm %s2310_s1, %s1379_s4  ;;  %s2314_s23 = sand.u32 1, %s1844_s18  }
  0x35   : > { %s420_s10 = sshll.u32 %s419_s13, 4  ;;  %s445_s13 = sshll.u32 %s436_s25, 4  ;;  %s421_s10 = int_to_ptr.hbm [resolvable:$true] %s420_s10  ;;  %s446_s13 = int_to_ptr.vmem [resolvable:$true] %s445_s13 }
  0x36   : > { %1425 = dma.hbm_to_vmem [thread:$0]  (!%p2013_p11), %s421_s10, 256, %s423_s30, %s2028_s28, %s2312_s11, %s2312_s11, %s2311_s9  }
  0x37   : > { %s372_s10 = sshll.u32 %s1850_s16, 4  ;;  %s1321_s30 = sshll.u32 %s2011_s12, 3  ;;  %s373_s10 = int_to_ptr.vmem [resolvable:$true] %s372_s10 }
  0x38   : > { %s442_s22 = scalar_lea.hbm %s2313_s2, %s1379_s4  ;;  %s1322_s4 = sshll.u32 %s1840_s17, 3 }
  0x39   : > { %s443_s1 = sshll.u32 %s442_s22, 4  ;;  %s398_s7 = scalar_lea.hbm %s2265_s0, %s1322_s4  ;;  %s444_s1 = int_to_ptr.hbm [resolvable:$true] %s443_s1 }
  0x3a   : > { %1418 = dma.hbm_to_vmem [thread:$0]  (!%p1976_p10), %s371_s27, 256, %s373_s10, [#allocation16], %s2312_s11, %s2312_s11, %s2311_s9  }
  0x3b   : > { %s393_s15 = scalar_lea.vmem [#allocation6], %s1321_s30  ;;  %s400_s22 = sshll.u32 %s398_s7, 4  ;;  %s401_s22 = int_to_ptr.hbm [resolvable:$true] %s400_s22 }
  0x3c   : > { %s402_s6 = sshll.u32 %s393_s15, 4  ;;  %s390_s16 = scalar_lea.sflag [#allocation7], %s2011_s12  ;;  %s403_s6 = int_to_ptr.vmem [resolvable:$true] %s402_s6 }
  0x3d   : > { %1422 = dma.hbm_to_vmem [thread:$0]  (!%p2013_p11), %s401_s22, 128, %s403_s6, %s390_s16  }
  0x3e   : > { %s465_s2 = scalar_lea.hbm %s2268_s3, %s1322_s4  ;;  %s459_s10 = scalar_lea.vmem [#allocation12], %s1321_s30 }
  0x3f   : > { %1428 = dma.hbm_to_vmem [thread:$0]  (!%p2013_p11), %s444_s1, 256, %s446_s13, %s2028_s28, %s2312_s11, %s2312_s11, %s2311_s9  }
  0x40   : > { %s467_s27 = sshll.u32 %s465_s2, 4  ;;  %s469_s20 = sshll.u32 %s459_s10, 4  ;;  %s468_s27 = int_to_ptr.hbm [resolvable:$true] %s467_s27  ;;  %s470_s20 = int_to_ptr.vmem [resolvable:$true] %s469_s20 }
  0x41   : > { %s456_s7 = scalar_lea.sflag [#allocation13], %s2314_s23  ;;  %478 = sbr.rel (%p1968_p8) target bundleno = 1441 (0x5a1), region = 60 }
  0x42   : > { %1431 = dma.hbm_to_vmem [thread:$0]  (!%p2013_p11), %s468_s27, 128, %s470_s20, %s456_s7  }
  0x43   : > { %s2071_s12 = sand.u32 (!%p1968_p8), 1, %s1828_s14  }
  0x44   : > { %s2074_s4 = sshll.u32 (!%p1968_p8), %s2071_s12, 3  ;;  %s481_s1 = scalar_lea.sflag (!%p1968_p8), [#allocation7], %s2071_s12 }
  0x45   : > { %s484_s2 = scalar_lea.vmem (!%p1968_p8), [#allocation6], %s2074_s4 }
  0x46   : > { %1799 = dma.done.wait (%p1955_p4), %s481_s1, 128  }
  0x47   : > { %1801 = vsyncadd (%p1955_p4), %s481_s1, 4294967168  ;;  %s490_s9 = sand.u32 1, %s1946_s19   ;;  %s1333_s26 = sshll.u32 %s2071_s12, 4 }
  0x48   : > { %s491_s24 = scalar_lea.sflag [#allocation10], %s490_s9  ;;  %s2084_s28 = scalar_lea.vmem [#allocation9], %s1333_s26 }
  0x49   : > { %1803 = dma.done.wait (%p1955_p4), %s491_s24, 512  }
  0x4a   : > { %1805 = vsyncadd (%p1955_p4), %s491_s24, 4294966784  ;;  %s2090_s11 = scalar_lea.vmem [#allocation11], %s1333_s26  ;;  %s511_s13 = scalar_lea.sflag [#allocation13], %s490_s9 }
  0x4b   : > { %s514_s30 = scalar_lea.vmem [#allocation12], %s2074_s4 }
  0x4c   : > { %1807 = dma.done.wait (%p1955_p4), %s511_s13, 128  }
  0x4d   : > { %1809 = vsyncadd (%p1955_p4), %s511_s13, 4294967168 }
  0x4e   : > { %1811 = dma.done.wait (%p75_p1), [#allocation13], 256  }
  0x4f   : > { %1813 = vsyncadd (%p75_p1), [#allocation13], 4294967040 }
  0x50   : > { %1815 = dma.done.wait (%p75_p1), [#allocation16], 512  }
  0x51   : > { %1817 = vsyncadd (%p75_p1), [#allocation16], 4294966784  ;;  %v1382_v0 = vld [vmem:[#allocation14 + $0x8] sm:$0xff]  ;;  %v1381_v1 = vld [vmem:[#allocation14] sm:$0xff]  ;;  %vm609_vm0 = vcmask 261120   ;;  %vm654_vm1 = vcmask 64512  }
  0x52   : > { %619 = vmatpush.bf16.msra.mxu0 %v1382_v0  ;;  %v2105_v2 = vld [vmem:[%s484_s2] sm:$0xff]  ;;  %v663_v4 = vld [vmem:[%s2084_s28] sm:$0xf]  ;;  %vm627_vm2 = vcmask 60416   ;;  %s1851_s15 = smov 104   ;;  %s1852_s6 = smov 120  }
  0x53   : > { %v588_v3 = vpack.c.bf16 %v2105_v2, %v2105_v2  ;;  %v672_v5 = vsel %vm654_vm1, %v663_v4, 0  ;;  %v1509_v6 = vld [vmem:[%s2270_s5] ss:$0 sm:$0xff]  ;;  %s1853_s22 = smov 112   ;;  %v664_v12 = vld [vmem:[%s2084_s28 + $0x4] sm:$0xf] }
  0x54   : > { %681 = vmatpush.bf16.xpose.msra.mxu1 %v672_v5  ;;  %v666_v13 = vld [vmem:[%s2084_s28 + $0xc] sm:$0xf]  ;;  %v691_v14 = vsel %vm654_vm1, %v664_v12, 0  ;;  %v665_v16 = vld [vmem:[%s2084_s28 + $0x8] sm:$0xf]  ;;  %vm645_vm3 = vcmask 7168  }
  0x55   : > { %v729_v15 = vsel %vm654_vm1, %v666_v13, 0  ;;  %700 = vmatpush.bf16.xpose.msra.mxu2 %v691_v14  ;;  %v710_v17 = vsel %vm654_vm1, %v665_v16, 0  ;;  %v1854_v26 = vmov -inf   ;;  %v744_v27 = vld [vmem:[%s514_s30] sm:$0xff]  ;;  %v1855_v40 = vmov 0.0   ;;  %s1857_s16 = smov 8  }
  0x56   : > { %620 = vmatpush.bf16.msra.mxu0 %v1381_v1  ;;  %719 = vmatpush.bf16.xpose.msra.mxu3 %v710_v17  ;;  %649 = vst.msk [vmem:[#allocation3 + $0x18] sm:$0xff] %vm645_vm3, %v1854_v26  ;;  %vm745_vm4 = vcmp.ne.f32.partialorder %v744_v27, 0.0  ;;  %v1856_v41 = vmov 0   ;;  %v879_v60 = vld [vmem:[%s2090_s11 + $0x8] sm:$0xf]  ;;  %vm884_vm5 = vcmask 1043456  }
  0x57   : > { %646 = vst.msk [vmem:[#allocation3] sm:$0xff] %vm645_vm3, %v1854_v26  ;;  %1506 = vset.pattern.permute.xlu0 %v1856_v41  ;;  %1507 = vset.pattern.permute.xlu2 %v1856_v41  ;;  %v924_v61 = vsel %vm884_vm5, %v879_v60, 0  ;;  %v880_v62 = vld [vmem:[%s2090_s11 + $0xc] sm:$0xf]  ;;  %v878_v0 = vld [vmem:[%s2090_s11 + $0x4] sm:$0xf] }
  0x58   : > { %647 = vst.msk [vmem:[#allocation3 + $0x8] sm:$0xff] %vm645_vm3, %v1854_v26  ;;  %1508 = vset.pattern.permute.xlu1 %v1856_v41  ;;  %v943_v63 = vsel %vm884_vm5, %v880_v62, 0  ;;  %v905_v1 = vsel %vm884_vm5, %v878_v0, 0  ;;  %s1858_s29 = smov 24   ;;  %s1859_s25 = smov 16   ;;  %vm1031_vm6 = vcmask 130048  }
  0x59   : > { %1348 = vmatmul.msk.bf16.vlgmr.msra.gmra.mxu0 %vm609_vm0, %v588_v3  ;;  %648 = vst.msk [vmem:[#allocation3 + $0x10] sm:$0xff] %vm645_vm3, %v1854_v26  ;;  %s2315_s27 = sld [smem:[#allocation27_spill]]  ;;  %vm1034_vm7 = vcmask 195584   ;;  %s581_s30 = scalar_lea.vmem [#allocation18], %s2074_s4 }
  0x5a   : > { %738 = vmatpush.bf16.xpose.msrb.mxu0 %v729_v15  ;;  %656 = vst.msk [vmem:[#allocation5 + $0x8] sm:$0xff] %vm654_vm1, %v1855_v40  ;;  %s2316_s23 = sld [smem:[#allocation36_spill]]  ;;  %s1128_s19 = sshll.u32 %s581_s30, 4  ;;  %s1129_s19 = int_to_ptr.vmem [resolvable:$true] %s1128_s19 }
  0x5b   : > { %650 = vst.msk [vmem:[#allocation4] sm:$0xff] %vm645_vm3, %v1855_v40  ;;  %s2317_s9 = sld [smem:[#allocation37_spill]] }
  0x5c   : > { %651 = vst.msk [vmem:[#allocation4 + $0x8] sm:$0xff] %vm645_vm3, %v1855_v40  ;;  %s2318_s28 = sld [smem:[#allocation38_spill]] }
  0x5d   : > { %652 = vst.msk [vmem:[#allocation4 + $0x10] sm:$0xff] %vm645_vm3, %v1855_v40  ;;  %v755_v42 = vld [vmem:[#allocation3 + $0x18] sm:$0xff]  ;;  %914 = vmatpush.bf16.msrb.mxu2 %v905_v1 }
  0x5e   : > { %653 = vst.msk [vmem:[#allocation4 + $0x18] sm:$0xff] %vm645_vm3, %v1855_v40  ;;  %933 = vmatpush.bf16.msrb.mxu3 %v924_v61 }
  0x5f   : > { %655 = vst.msk [vmem:[#allocation5] sm:$0xff] %vm654_vm1, %v1855_v40  ;;  %v753_v46 = vld [vmem:[#allocation3 + $0x8] sm:$0xff]  ;;  %s1376_s7 = sshll.u32 %s2315_s27, 3 }
  0x60   : > { %657 = vst.msk [vmem:[#allocation5 + $0x10] sm:$0xff] %vm654_vm1, %v1855_v40  ;;  %v2157_v49 = vld [vmem:[#allocation3 + $0x10] sm:$0xff] }
  0x61   : > { %658 = vst.msk [vmem:[#allocation5 + $0x18] sm:$0xff] %vm654_vm1, %v1855_v40 }
  0x62   : > { %952 = vmatpush.bf16.msra.mxu0 %v943_v63  ;;  %s1126_s13 = scalar_lea.hbm %s2318_s28, %s1376_s7  ;;  %s1766_s4 = scalar_lea.hbm %s2318_s28, 16 }
  0x63   : > { %s1130_s21 = sshll.u32 %s1126_s13, 4  ;;  %s1131_s21 = int_to_ptr.hbm [resolvable:$true] %s1130_s21 }
  0x64   : > { %v818_v0 = vld [vmem:[#allocation4 + $0x10] sm:$0xff] }
  0xd6   : > { %v622_v7 = vpop.f32.mrf.mxu0 }
  0xd7   : > { %v623_v8 = vadd.f32 %v1509_v6, %v622_v7 }
  0xd9   : > { %v626_v9 = vpack.c.bf16 %v623_v8, %v623_v8 }
  0xdb   : > { %628 = vst.msk [vmem:[#allocation2] sm:$0xf] %vm627_vm2, %v626_v9  ;;  %640 = vrot.lane.b32.xlu1 %v626_v9, %s1851_s15  ;;  %630 = vrot.lane.b32.xlu0 %v626_v9, %s1852_s6  ;;  %s1115_s15 = scalar_lea.sflag [#allocation8], %s2071_s12  ;;  %s1760_s6 = sshra.s32 %s1131_s21, 4  ;;  %s1761_s6 = int_to_ptr.hbm [resolvable:$true] %s1760_s6 }
  0xdc   : > { %p1767_p8 = scmp.lt.s32.totalorder %s1761_s6, %s2318_s28 }
  0xde   : > { %v624_v10 = vpop.f32.mrf.mxu0 }
  0xe2   : > { %v659_v11 = vld [vmem:[#allocation2] sm:$0xf] }
  0xe3   : > { %635 = vrot.lane.b32.xlu0 %v626_v9, %s1853_s22  ;;  %1349 = vmatmul.msk.bf16.vlgmr.msra.gmra.mxu1 %vm654_vm1, %v659_v11  ;;  %s1762_s22 = scalar_lea.hbm %s1761_s6, 8 }
  0xe4   : > { %p1763_p1 = scmp.ne.s32.totalorder %s1761_s6, %s1762_s22  ;;  %p1768_p10 = scmp.lt.s32.totalorder %s1766_s4, %s1762_s22 }
  0xe6   : > { %p1764_p2 = pnand %p1763_p1, %p2004_p7  ;;  %p1769_p11 = por %p1768_p10, %p1767_p8 }
  0xe8   : > { %p1765_p4 = pneg %p1764_p2 }
  0xea   : > { %p1770_p12 = pnand %p1769_p11, %p1765_p4 }
 0x14d   : > { %v641_v18 = vpop.permute.xlu1 %640  ;;  %v631_v19 = vpop.permute.xlu0 %630 }
 0x14e   : > { %644 = vst.msk [vmem:[#allocation2 + $0xc] sm:$0xf] %vm627_vm2, %v641_v18 }
 0x14f   : > { %634 = vst.msk [vmem:[#allocation2 + $0x4] sm:$0xf] %vm627_vm2, %v631_v19 }
 0x155   : > { %v636_v20 = vpop.permute.xlu0 %635  ;;  %v662_v21 = vld [vmem:[#allocation2 + $0xc] sm:$0xf] }
 0x156   : > { %639 = vst.msk [vmem:[#allocation2 + $0x8] sm:$0xf] %vm627_vm2, %v636_v20  ;;  %v660_v22 = vld [vmem:[#allocation2 + $0x4] sm:$0xf]  ;;  %1352 = vmatmul.msk.bf16.vlgmr.msrb.gmra.mxu0 %vm654_vm1, %v662_v21  ;;  %v2185_v20 = vld [vmem:[#allocation3] sm:$0xff] }
 0x157   : > { %1350 = vmatmul.msk.bf16.vlgmr.msra.gmra.mxu2 %vm654_vm1, %v660_v22 }
 0x15d   : > { %v661_v23 = vld [vmem:[#allocation2 + $0x8] sm:$0xf] }
 0x15e   : > { %1351 = vmatmul.msk.bf16.vlgmr.msra.gmra.mxu3 %vm654_vm1, %v661_v23 }
 0x160   : > { %v683_v24 = vpop.f32.mrf.mxu1 }
 0x161   : > { %v2168_v53 = vsel %vm745_vm4, %v683_v24, -1e+09 }
 0x162   : > { %v756_v54 = vsel %vm654_vm1, %v2168_v53, -inf }
 0x168   : > { %v685_v25 = vpop.f32.mrf.mxu1 }
 0x169   : > { %v877_v25 = vld [vmem:[%s2090_s11] sm:$0xf] }
 0x16a   : > { %v886_v26 = vsel %vm884_vm5, %v877_v25, 0 }
 0x16b   : > { %895 = vmatpush.bf16.msrb.mxu1 %v886_v26  ;;  %v847_v26 = vld [vmem:[#allocation5 + $0x10] sm:$0xff] }
 0x1d3   : > { %v740_v28 = vpop.f32.mrf.mxu0 }
 0x1d4   : > { %v2136_v29 = vsel %vm745_vm4, %v740_v28, -1e+09  ;;  %v817_v28 = vld [vmem:[#allocation4 + $0x8] sm:$0xff] }
 0x1d5   : > { %v765_v30 = vsel %vm654_vm1, %v2136_v29, -inf }
 0x1d6   : > { %766 = vmax.xlane.f32.xlu2 %v765_v30 }
 0x1da   : > { %v702_v31 = vpop.f32.mrf.mxu2 }
 0x1db   : > { %v2141_v32 = vsel %vm745_vm4, %v702_v31, -1e+09  ;;  %v742_v33 = vpop.f32.mrf.mxu0 }
 0x1dc   : > { %v759_v34 = vsel %vm654_vm1, %v2141_v32, -inf }
 0x1dd   : > { %760 = vmax.xlane.f32.xlu1 %v759_v34 }
 0x1e1   : > { %v721_v35 = vpop.f32.mrf.mxu3 }
 0x1e2   : > { %v704_v36 = vpop.f32.mrf.mxu2  ;;  %v750_v37 = vsel %vm745_vm4, %v721_v35, -1e+09 }
 0x1e3   : > { %v762_v38 = vsel %vm654_vm1, %v750_v37, -inf }
 0x1e4   : > { %763 = vmax.xlane.f32.xlu2 %v762_v38  ;;  %v819_v38 = vld [vmem:[#allocation4 + $0x18] sm:$0xff] }
 0x1e9   : > { %v723_v39 = vpop.f32.mrf.mxu3 }
 0x249   : > { %v767_v43 = vpop.xlane.xlu2 %766 }
 0x24a   : > { %v771_v44 = vmax.f32 %v755_v42, %v767_v43 }
 0x24c   : > { %v775_v45 = vsub.f32 %v755_v42, %v771_v44  ;;  %969 = vst.msk [vmem:[#allocation3 + $0x18] sm:$0xff] %vm645_vm3, %v771_v44 }
 0x24e   : > { %v782_v57 = vmul.f32 1.442695, %v775_v45 }
 0x250   : > { %v761_v47 = vpop.xlane.xlu1 %760 }
 0x251   : > { %v769_v48 = vmax.f32 %v753_v46, %v761_v47 }
 0x253   : > { %967 = vst.msk [vmem:[#allocation3 + $0x8] sm:$0xff] %vm645_vm3, %v769_v48  ;;  %791 = vperm.xlu0 %1506, %v769_v48   ;;  %v773_v55 = vsub.f32 %v753_v46, %v769_v48  ;;  %v846_v48 = vld [vmem:[#allocation5 + $0x8] sm:$0xff] }
 0x255   : > { %v778_v56 = vmul.f32 1.442695, %v773_v55 }
 0x257   : > { %v764_v50 = vpop.xlane.xlu2 %763  ;;  %1512 = vpow2.f32 %v778_v56 }
 0x258   : > { %v2160_v51 = vmax.f32 %v2157_v49, %v764_v50  ;;  %1514 = vpow2.f32 %v782_v57 }
 0x25a   : > { %v774_v52 = vsub.f32 %v2157_v49, %v2160_v51  ;;  %968 = vst.msk [vmem:[#allocation3 + $0x10] sm:$0xff] %vm645_vm3, %v2160_v51  ;;  %796 = vperm.xlu2 %1507, %v2160_v51  }
 0x25c   : > { %v780_v62 = vmul.f32 1.442695, %v774_v52 }
 0x25d   : > { %v1513_v58 = vpop.eup %1512 }
 0x25e   : > { %v1515_v59 = vpop.eup %1514  ;;  %v821_v31 = vmul.f32 %v1513_v58, %v817_v28 }
 0x25f   : > { %v823_v39 = vmul.f32 %v1515_v59, %v819_v38 }
 0x262   : > { %801 = vperm.xlu2 %1507, %v771_v44  }
 0x27d   : > { %757 = vmax.xlane.f32.xlu0 %v756_v54 }
 0x291   : > { %856 = vperm.xlu0 %1506, %v1513_v58  }
 0x299   : > { %866 = vperm.xlu0 %1506, %v1515_v59  }
 0x2b4   : > { %v797_v3 = vpop.permute.xlu2 %796 }
 0x2b5   : > { %v806_v4 = vsub.f32 %v750_v37, %v797_v3 }
 0x2b7   : > { %v812_v5 = vmul.f32 1.442695, %v806_v4 }
 0x2b9   : > { %1516 = vpow2.f32 %v812_v5 }
 0x2bc   : > { %v802_v6 = vpop.permute.xlu2 %801 }
 0x2bd   : > { %v807_v7 = vsub.f32 %v2136_v29, %v802_v6  ;;  %v848_v29 = vld [vmem:[#allocation5 + $0x18] sm:$0xff] }
 0x2bf   : > { %v1517_v8 = vpop.eup %1516  ;;  %v814_v9 = vmul.f32 1.442695, %v807_v7 }
 0x2c0   : > { %v875_v10 = vpack.c.bf16 %v1517_v8, %v1517_v8  ;;  %v830_v24 = vsel %vm654_vm1, %v1517_v8, 0.0 }
 0x2c1   : > { %1518 = vpow2.f32 %v814_v9 }
 0x2c2   : > { %1355 = vmatmul.msk.bf16.vlgmr.msrb.gmra.mxu3 %vm654_vm1, %v875_v10 }
 0x2c5   : > { %v792_v11 = vpop.permute.xlu0 %791 }
 0x2c6   : > { %v805_v12 = vsub.f32 %v2141_v32, %v792_v11 }
 0x2c7   : > { %v1519_v13 = vpop.eup %1518 }
 0x2c8   : > { %v876_v14 = vpack.c.bf16 %v1519_v13, %v1519_v13  ;;  %v810_v15 = vmul.f32 1.442695, %v805_v12  ;;  %v833_v19 = vsel %vm654_vm1, %v1519_v13, 0.0  ;;  %v816_v12 = vld [vmem:[#allocation4] sm:$0xff] }
 0x2ca   : > { %1520 = vpow2.f32 %v810_v15  ;;  %1356 = vmatmul.msk.bf16.vlgmr.msra.gmra.mxu0 %vm654_vm1, %v876_v14 }
 0x2d0   : > { %v1521_v16 = vpop.eup %1520 }
 0x2d1   : > { %v827_v17 = vsel %vm654_vm1, %v1521_v16, 0.0  ;;  %v874_v18 = vpack.c.bf16 %v1521_v16, %v1521_v16 }
 0x2d2   : > { %828 = vadd.xlane.f32.xlu1 %v827_v17 }
 0x2d3   : > { %1354 = vmatmul.msk.bf16.vlgmr.msrb.gmra.mxu2 %vm654_vm1, %v874_v18 }
 0x2da   : > { %834 = vadd.xlane.f32.xlu1 %v833_v19 }
 0x2f0   : > { %v758_v21 = vpop.xlane.xlu0 %757 }
 0x2f1   : > { %v2188_v22 = vmax.f32 %v2185_v20, %v758_v21 }
 0x2f3   : > { %v772_v23 = vsub.f32 %v2185_v20, %v2188_v22  ;;  %966 = vst.msk [vmem:[#allocation3] sm:$0xff] %vm645_vm3, %v2188_v22  ;;  %786 = vperm.xlu2 %1507, %v2188_v22  }
 0x2f5   : > { %v776_v6 = vmul.f32 1.442695, %v772_v23 }
 0x303   : > { %v857_v27 = vpop.permute.xlu0 %856 }
 0x304   : > { %v870_v50 = vmul.f32 %v857_v27, %v846_v48 }
 0x30b   : > { %v867_v30 = vpop.permute.xlu0 %866 }
 0x30c   : > { %v872_v34 = vmul.f32 %v867_v30, %v848_v29 }
 0x31c   : > { %831 = vadd.xlane.f32.xlu2 %v830_v24 }
 0x345   : > { %v829_v32 = vpop.xlane.xlu1 %828  ;;  %v2198_v33 = vpop.f32.mrf.mxu3 }
 0x346   : > { %v837_v35 = vadd.f32 %v829_v32, %v821_v31 }
 0x347   : > { %v954_v36 = vpop.f32.mrf.mxu0 }
 0x348   : > { %842 = vst.msk [vmem:[#allocation4 + $0x8] sm:$0xff] %vm645_vm3, %v837_v35  ;;  %v961_v37 = vadd.f32 %v954_v36, %v872_v34  ;;  %v845_v36 = vld [vmem:[#allocation5] sm:$0xff] }
 0x34a   : > { %965 = vst.msk [vmem:[#allocation5 + $0x18] sm:$0xff] %vm654_vm1, %v961_v37 }
 0x34d   : > { %v835_v40 = vpop.xlane.xlu1 %834  ;;  %v787_v41 = vpop.permute.xlu2 %786 }
 0x34e   : > { %v839_v42 = vadd.f32 %v835_v40, %v823_v39  ;;  %v804_v43 = vsub.f32 %v2168_v53, %v787_v41  ;;  %v937_v44 = vpop.f32.mrf.mxu3  ;;  %v1384_v41 = vld [vmem:[#allocation15 + $0x8] sm:$0xff] }
 0x34f   : > { %v956_v45 = vpop.f32.mrf.mxu0  ;;  %v978_v46 = vld [vmem:[#allocation4 + $0x8] sm:$0xff]  ;;  %1066 = vmatpush.bf16.msra.mxu1 %v1384_v41 }
 0x350   : > { %844 = vst.msk [vmem:[#allocation4 + $0x18] sm:$0xff] %vm645_vm3, %v839_v42  ;;  %v808_v47 = vmul.f32 1.442695, %v804_v43  ;;  %1522 = vrcp.f32 %v978_v46  ;;  %v1383_v42 = vld [vmem:[#allocation15] sm:$0xff]  ;;  %v1385_v43 = vld [vmem:[#allocation17] sm:$0xff] }
 0x351   : > { %v976_v16 = vld [vmem:[#allocation5 + $0x18] sm:$0xff] }
 0x352   : > { %1524 = vpow2.f32 %v808_v47 }
 0x353   : > { %1067 = vmatpush.bf16.msra.mxu1 %v1383_v42 }
 0x356   : > { %v1523_v54 = vpop.eup %1522  ;;  %v916_v55 = vpop.f32.mrf.mxu2 }
 0x357   : > { %v959_v56 = vadd.f32 %v916_v55, %v870_v50  ;;  %992 = vperm.xlu2 %1507, %v1523_v54   ;;  %v980_v57 = vld [vmem:[#allocation4 + $0x18] sm:$0xff] }
 0x358   : > { %v1525_v58 = vpop.eup %1524  ;;  %1526 = vrcp.f32 %v980_v57 }
 0x359   : > { %963 = vst.msk [vmem:[#allocation5 + $0x8] sm:$0xff] %vm654_vm1, %v959_v56  ;;  %v824_v53 = vsel %vm654_vm1, %v1525_v58, 0.0  ;;  %v873_v59 = vpack.c.bf16 %v1525_v58, %v1525_v58  ;;  %1528 = vpow2.f32 %v780_v62  ;;  %v1510_v58 = vld [vmem:[%s2316_s23] ss:$0 sm:$0xff] }
 0x35a   : > { %825 = vadd.xlane.f32.xlu1 %v824_v53 }
 0x35b   : > { %1353 = vmatmul.msk.bf16.vlgmr.msrb.gmra.mxu1 %vm654_vm1, %v873_v59 }
 0x35e   : > { %v1527_v60 = vpop.eup %1526  ;;  %v918_v61 = vpop.f32.mrf.mxu2 }
 0x35f   : > { %1002 = vperm.xlu0 %1506, %v1527_v60   ;;  %v1529_v63 = vpop.eup %1528 }
 0x360   : > { %v822_v1 = vmul.f32 %v1529_v63, %v818_v0  ;;  %v974_v49 = vld [vmem:[#allocation5 + $0x8] sm:$0xff] }
 0x373   : > { %861 = vperm.xlu1 %1508, %v1529_v63   ;;  %v1511_v63 = vld [vmem:[%s2317_s9] ss:$0 sm:$0xff] }
 0x38f   : > { %v832_v3 = vpop.xlane.xlu2 %831 }
 0x390   : > { %v838_v4 = vadd.f32 %v832_v3, %v822_v1 }
 0x392   : > { %843 = vst.msk [vmem:[#allocation4 + $0x10] sm:$0xff] %vm645_vm3, %v838_v4 }
 0x399   : > { %v979_v5 = vld [vmem:[#allocation4 + $0x10] sm:$0xff] }
 0x39a   : > { %1530 = vrcp.f32 %v979_v5 }
 0x39b   : > { %1532 = vpow2.f32 %v776_v6 }
 0x3a0   : > { %v1531_v7 = vpop.eup %1530 }
 0x3a1   : > { %997 = vperm.xlu1 %1508, %v1531_v7   ;;  %v1533_v8 = vpop.eup %1532 }
 0x3a2   : > { %v820_v13 = vmul.f32 %v1533_v8, %v816_v12 }
 0x3a9   : > { %851 = vperm.xlu1 %1508, %v1533_v8  }
 0x3b1   : > { %v993_v9 = vpop.permute.xlu2 %992 }
 0x3b2   : > { %v1006_v51 = vmul.f32 %v993_v9, %v974_v49 }
 0x3b4   : > { %v1010_v52 = vpack.c.bf16 %v1006_v51, %v1006_v51 }
 0x3b6   : > { %v1014_v10 = vunpack.c.l.b16 %v1010_v52 }
 0x3b8   : > { %v1015_v11 = vpack.c.b16 %v1014_v10, %v1014_v10 }
 0x3ba   : > { %1016 = vrot.lane.b32.xlu1 %v1015_v11, %s1857_s16 }
 0x3cd   : > { %v826_v14 = vpop.xlane.xlu1 %825 }
 0x3ce   : > { %v836_v15 = vadd.f32 %v826_v14, %v820_v13 }
 0x3d0   : > { %841 = vst.msk [vmem:[#allocation4] sm:$0xff] %vm645_vm3, %v836_v15 }
 0x3d1   : > { %v1003_v17 = vpop.permute.xlu0 %1002 }
 0x3d2   : > { %v1008_v18 = vmul.f32 %v1003_v17, %v976_v16 }
 0x3d4   : > { %v1012_v19 = vpack.c.bf16 %v1008_v18, %v1008_v18 }
 0x3d6   : > { %v1024_v20 = vunpack.c.l.b16 %v1012_v19 }
 0x3d7   : > { %v977_v21 = vld [vmem:[#allocation4] sm:$0xff] }
 0x3d8   : > { %v1025_v22 = vpack.c.b16 %v1024_v20, %v1024_v20  ;;  %v897_v23 = vpop.f32.mrf.mxu1  ;;  %1534 = vrcp.f32 %v977_v21 }
 0x3da   : > { %1026 = vrot.lane.b32.xlu2 %v1025_v22, %s1858_s29 }
 0x3de   : > { %v1535_v24 = vpop.eup %1534 }
 0x3df   : > { %987 = vperm.xlu0 %1506, %v1535_v24  }
 0x3e0   : > { %v899_v25 = vpop.f32.mrf.mxu1 }
 0x3e5   : > { %v862_v27 = vpop.permute.xlu1 %861 }
 0x3e6   : > { %v871_v28 = vmul.f32 %v862_v27, %v847_v26 }
 0x3e8   : > { %v960_v29 = vadd.f32 %v2198_v33, %v871_v28  ;;  %v1386_v33 = vld [vmem:[#allocation17 + $0x8] sm:$0xff] }
 0x3e9   : > { %1105 = vmatpush.bf16.msra.mxu2 %v1386_v33 }
 0x3ea   : > { %964 = vst.msk [vmem:[#allocation5 + $0x10] sm:$0xff] %vm654_vm1, %v960_v29 }
 0x3ed   : > { %1106 = vmatpush.bf16.msra.mxu2 %v1385_v43 }
 0x3f1   : > { %v975_v30 = vld [vmem:[#allocation5 + $0x10] sm:$0xff] }
 0x413   : > { %v998_v31 = vpop.permute.xlu1 %997 }
 0x414   : > { %v1007_v32 = vmul.f32 %v998_v31, %v975_v30 }
 0x416   : > { %v1011_v34 = vpack.c.bf16 %v1007_v32, %v1007_v32 }
 0x418   : > { %v1019_v35 = vunpack.c.l.b16 %v1011_v34 }
 0x41a   : > { %v1020_v37 = vpack.c.b16 %v1019_v35, %v1019_v35 }
 0x41b   : > { %v852_v38 = vpop.permute.xlu1 %851 }
 0x41c   : > { %v869_v39 = vmul.f32 %v852_v38, %v845_v36  ;;  %1021 = vrot.lane.b32.xlu0 %v1020_v37, %s1859_s25 }
 0x41e   : > { %v958_v40 = vadd.f32 %v897_v23, %v869_v39 }
 0x420   : > { %962 = vst.msk [vmem:[#allocation5] sm:$0xff] %vm654_vm1, %v958_v40 }
 0x427   : > { %v973_v45 = vld [vmem:[#allocation5] sm:$0xff] }
 0x42c   : > { %v1017_v48 = vpop.permute.xlu1 %1016 }
 0x434   : > { %v1027_v55 = vpop.permute.xlu2 %1026 }
 0x451   : > { %v988_v44 = vpop.permute.xlu0 %987 }
 0x452   : > { %v1005_v46 = vmul.f32 %v988_v44, %v973_v45 }
 0x454   : > { %v1009_v47 = vpack.c.bf16 %v1005_v46, %v1005_v46 }
 0x456   : > { %v1030_v54 = vsel %vm654_vm1, %v1009_v47, %v1017_v48 }
 0x48e   : > { %v1022_v50 = vpop.permute.xlu0 %1021 }
 0x48f   : > { %v1033_v56 = vsel %vm1031_vm6, %v1030_v54, %v1022_v50 }
 0x490   : > { %v1036_v57 = vsel %vm1034_vm7, %v1033_v56, %v1027_v55 }
 0x491   : > { %1365 = vmatmul.msk.bf16.vlgmr.msra.gmra.mxu1 %vm609_vm0, %v1036_v57 }
 0x50e   : > { %v1069_v53 = vpop.f32.mrf.mxu1 }
 0x50f   : > { %v1070_v59 = vadd.f32 %v1510_v58, %v1069_v53 }
 0x511   : > { %v1074_v60 = vadd.f32 %v1070_v59, %v2105_v2 }
 0x513   : > { %v1075_v61 = vpack.c.bf16 %v1074_v60, %v1074_v60 }
 0x515   : > { %1374 = vmatmul.msk.bf16.vlgmr.msra.gmra.mxu2 %vm609_vm0, %v1075_v61 }
 0x516   : > { %v1071_v62 = vpop.f32.mrf.mxu1 }
 0x598   : > { %v1108_v0 = vpop.f32.mrf.mxu2 }
 0x599   : > { %v1109_v2 = vadd.f32 %v1511_v63, %v1108_v0 }
 0x59b   : > { %v1112_v1 = vadd.f32 %v1109_v2, %v1074_v60 }
 0x59d   : > { %1113 = vst.msk [vmem:[%s581_s30] sm:$0xff] %vm609_vm0, %v1112_v1 }
 0x59e   : > { %1773 = shalt.err (!%p1770_p12)
}
 0x59f   : > { %1407 = dma.vmem_to_hbm [thread:$0]  (%p2004_p7), %s1129_s19, 128, %s1131_s21, %s1115_s15  }
 0x5a0   : > { %v1110_v3 = vpop.f32.mrf.mxu2 }
 0x5a1 PF: > { %s2320_s12 = sld [smem:[#allocation25_spill]]  ;;  %p2322_p13 = scmp.ge.s32.totalorder %s1844_s18, 2 }
 0x5a3   : > { %p1433_p0 = pnand %p2322_p13, %p1960_p6 }
 0x5a5   : > { %p1434_p3 = pneg %p1433_p0 }
 0x5a7   : > { %s1142_s20 = sand.u32 1, %s2320_s12  }
 0x5a8   : > { %s1143_s23 = scalar_lea.sflag [#allocation8], %s1142_s20 }
 0x5a9   : > { %1819 = dma.done.wait (%p1434_p3), %s1143_s23, 128  }
 0x5aa   : > { %1821 = vsyncadd (%p1434_p3), %s1143_s23, 4294967168  ;;  %s33_s18 = sadd.s32 1, %s1844_s18   ;;  %s2323_s7 = sld [smem:[#allocation26_spill]] }
 0x5ab   : > { %p30_p5 = scmp.ge.s32.totalorder %s33_s18, 4   ;;  %s2324_s15 = sld [smem:[#allocation31_spill]] }
 0x5ac   : > { %s2325_s1 = sld [smem:[#allocation29_spill]]  ;;  %s2326_s13 = smov %s1828_s14 }
 0x5ad   : > { %s2328_s16 = smov %s1840_s17 }
 0x5ae   :  { %32 = sbr.rel (!%p30_p5) target bundleno = 19 (0x13), region = 165 }
 0x5b0   : > { %s2327_s14 = smov %s2323_s7 }
 0x5b2   : > { %s2329_s17 = smov %s2325_s1 }
 0x5b3   :  { %1149 = vsyncpa [#allocation7], 1 }
 0x5b4   :  { %1151 = vsyncpa [#allocation7 + $0x1], 1 }
 0x5b5   :  { %1152 = vsyncpa [#allocation10], 1 }
 0x5b6   :  { %1154 = vsyncpa [#allocation10 + $0x1], 1 }
 0x5b7   :  { %1155 = vsyncpa [#allocation13], 1 }
 0x5b8   :  { %1157 = vsyncpa [#allocation13 + $0x1], 1 }
 0x5b9   :  { %1158 = vsyncpa [#allocation16], 1 }
 0x5ba   :  { %1159 = vsyncpa [#allocation8], 1 }
 0x5bb   :  { %1161 = vsyncpa [#allocation8 + $0x1], 1 }

</bundles_post_ra>
